<compile_context>
chip_gen: v6e
topology: v6e:2x2x1
jax: 0.10.0
libtpu: 0.0.40
codegen_flags: <defaults>
</compile_context>

<pallas_src>
import functools

import jax
import jax.numpy as jnp
from jax.experimental import pallas as pl
from jax.experimental.pallas import tpu as pltpu


def _roundup(x, m):
    return ((x + m - 1) // m) * m


# ----------------------------------------------------------------------------
# Kernel
# ----------------------------------------------------------------------------
def _node_decoder_kernel(z_ref, w_ref, b_ref, out_ref, *, lp, rp, h2p, cout):
    f32 = jnp.float32
    bf16 = jnp.bfloat16
    L = z_ref.shape[-1]

    z = z_ref[...].astype(bf16)                          # [TM, L]

    # Static, tile-aligned views into the packed bf16 weight slab
    # (per-layer live widths -> no zero-padded K inflation).
    w_ld = w_ref[0:L, 0:rp]                              # latent_decode    [L,   Rp]
    w_rd = w_ref[lp:lp + rp, 0:h2p]                      # reparam_decode   [Rp,  H2p]
    w_hd = w_ref[lp + rp:lp + rp + h2p, 0:cout]          # block-diag heads [H2p, Cout]

    b = b_ref[...]                                       # [3, Cmax] f32
    b_ld = b[0:1, 0:rp]
    b_rd = b[1:2, 0:h2p]
    b_hd = b[2:3, 0:cout]

    # z_decode_1 = relu(latent_decode(z))
    d1 = jnp.maximum(jnp.dot(z, w_ld, preferred_element_type=f32) + b_ld, 0.0)
    # z_decode_2 = relu(reparam_decode(z_decode_1))
    d2 = jnp.maximum(
        jnp.dot(d1.astype(bf16), w_rd, preferred_element_type=f32) + b_rd, 0.0)

    # torch.chunk(d2, 2) + feat_decode / neighbor_decode fused as one
    # block-diagonal matmul. temp=0.5 is already folded into the neighbor-half
    # weights/bias at pack time, so no per-column scaling is needed here.
    logits = jnp.dot(d2.astype(bf16), w_hd, preferred_element_type=f32) + b_hd

    # TODO(synk): if the consumer is a BCE-with-logits loss, return `logits`
    # and drop the sigmoid (EUP is the 1-slot unit); module semantics keep it.
    out_ref[...] = jax.nn.sigmoid(logits).astype(out_ref.dtype)


# ----------------------------------------------------------------------------
# Wrapper
# ----------------------------------------------------------------------------
def node_decoder_forward(z, w_slab, b_slab, dims, *, feat_dim, nmap_dim,
                         block_rows=512, out_dtype=jnp.float32):
    N, L = z.shape
    lp, rp, h2p, cout = dims["lp"], dims["rp"], dims["h2p"], dims["cout"]

    tm = min(block_rows, N)
    assert N % tm == 0, "demo wrapper assumes N is a multiple of the row tile"

    kernel = functools.partial(
        _node_decoder_kernel, lp=lp, rp=rp, h2p=h2p, cout=cout)

    out = pl.pallas_call(
        kernel,
        # out_dtype=jnp.bfloat16 halves the dominant writeback stream if the
        # consumer tolerates it; f32 kept here for the strict demo checks.
        out_shape=jax.ShapeDtypeStruct((N, cout), out_dtype),
        grid_spec=pltpu.PrefetchScalarGridSpec(
            num_scalar_prefetch=0,
            grid=(N // tm,),
            in_specs=[
                pl.BlockSpec((tm, L), lambda i: (i, 0)),        # z row tile
                pl.BlockSpec(w_slab.shape, lambda i: (0, 0)),   # bf16 weight slab (constant index -> no re-DMA)
                pl.BlockSpec(b_slab.shape, lambda i: (0, 0)),   # f32 bias slab
            ],
            out_specs=pl.BlockSpec((tm, cout), lambda i: (i, 0)),  # lane-dense output
        ),
        compiler_params=pltpu.CompilerParams(
            dimension_semantics=("parallel",),   # v7x: shards row tiles over 2 TCs
        ),
    )(z, w_slab, b_slab)

    feat = out[:, :feat_dim]
    neighbor_map = out[:, feat_dim:feat_dim + nmap_dim]
    return feat, neighbor_map


# ----------------------------------------------------------------------------
# Host-side parameter packing (kernel layout: W is [in, out], weights in bf16)
# ----------------------------------------------------------------------------
def pack_decoder_params(p, *, latent_dim, reparam_dim, hidden_dim, feat_dim,
                        nmap_dim, temp=0.5):
    L, R, H = latent_dim, reparam_dim, hidden_dim
    Lp = _roundup(L, 8)                 # sublane-aligned row offset
    Rp = _roundup(R, 128)               # layer-1 output / layer-2 K
    H2p = _roundup(2 * H, 128)          # layer-2 output / layer-3 K
    Cout = _roundup(feat_dim + nmap_dim, 128)
    Cmax = max(Rp, H2p, Cout)
    inv_temp = 1.0 / temp               # folded into the neighbor head

    w_slab = jnp.zeros((Lp + Rp + H2p, Cmax), jnp.float32)
    w_slab = w_slab.at[0:L, 0:R].set(p["w_ld"])
    w_slab = w_slab.at[Lp:Lp + R, 0:2 * H].set(p["w_rd"])
    # block-diagonal head: top rows = feat_decode over chunk 0,
    #                      bottom rows = (1/temp)*neighbor_decode over chunk 1
    w_slab = w_slab.at[Lp + Rp:Lp + Rp + H, 0:feat_dim].set(p["w_fd"])
    w_slab = w_slab.at[Lp + Rp + H:Lp + Rp + 2 * H,
                       feat_dim:feat_dim + nmap_dim].set(inv_temp * p["w_nd"])
    w_slab = w_slab.astype(jnp.bfloat16)

    b_slab = jnp.zeros((3, Cmax), jnp.float32)
    b_slab = b_slab.at[0, 0:R].set(p["b_ld"])
    b_slab = b_slab.at[1, 0:2 * H].set(p["b_rd"])
    b_slab = b_slab.at[2, 0:feat_dim].set(p["b_fd"])
    b_slab = b_slab.at[2, feat_dim:feat_dim + nmap_dim].set(inv_temp * p["b_nd"])

    dims = dict(lp=Lp, rp=Rp, h2p=H2p, cout=Cout)
    return w_slab, b_slab, dims


def init_decoder_params(key, feat_dim, hidden_dim, reparam_dim, latent_dim, nmap_dim):
    ks = jax.random.split(key, 8)

    def w(k, shape, scale=0.2):
        return (scale * jax.random.normal(k, shape)).astype(jnp.float32)

    return dict(
        w_ld=w(ks[0], (latent_dim, reparam_dim)),     b_ld=w(ks[1], (reparam_dim,), 0.05),
        w_rd=w(ks[2], (reparam_dim, 2 * hidden_dim)), b_rd=w(ks[3], (2 * hidden_dim,), 0.05),
        w_fd=w(ks[4], (hidden_dim, feat_dim)),        b_fd=w(ks[5], (feat_dim,), 0.05),
        w_nd=w(ks[6], (hidden_dim, nmap_dim)),        b_nd=w(ks[7], (nmap_dim,), 0.05),
    )


def reference_forward(z, p, *, hidden_dim, temp=0.5):
    """Pure-JAX transcription of node_decoder.forward (correctness oracle, f32)."""
    d1 = jax.nn.relu(z @ p["w_ld"] + p["b_ld"])
    d2 = jax.nn.relu(d1 @ p["w_rd"] + p["b_rd"])
    feat_half, nb_half = d2[:, :hidden_dim], d2[:, hidden_dim:]
    feat = jax.nn.sigmoid(feat_half @ p["w_fd"] + p["b_fd"])
    neighbor_map = jax.nn.sigmoid((nb_half @ p["w_nd"] + p["b_nd"]) / temp)
    return feat, neighbor_map


# ----------------------------------------------------------------------------
# Demo
# ----------------------------------------------------------------------------
if __name__ == "__main__":
    # Small, module-consistent shapes (scaled-down feat/hidden/reparam/latent/
    # neighbor-map dims; 256 latent rows batched along M so matmul M is MXU-sized).
    N = 256
    FEAT, HID, REP, LAT, NMAP = 64, 32, 32, 16, 64

    key = jax.random.PRNGKey(0)
    kz, kp = jax.random.split(key)

    z = jax.random.normal(kz, (N, LAT), dtype=jnp.float32)
    params = init_decoder_params(kp, FEAT, HID, REP, LAT, NMAP)
    w_slab, b_slab, dims = pack_decoder_params(
        params, latent_dim=LAT, reparam_dim=REP, hidden_dim=HID,
        feat_dim=FEAT, nmap_dim=NMAP)

    feat, neighbor_map = node_decoder_forward(
        z, w_slab, b_slab, dims, feat_dim=FEAT, nmap_dim=NMAP, block_rows=512)
    feat, neighbor_map = jax.block_until_ready((feat, neighbor_map))

    # Correctness against the pure-f32 reference of the PyTorch module
    # (tolerance loosened for the bf16 matmul datapath).
    feat_r, nmap_r = reference_forward(z, params, hidden_dim=HID)

    assert feat.shape == (N, FEAT) and neighbor_map.shape == (N, NMAP)
    assert bool(jnp.all(jnp.isfinite(feat))) and bool(jnp.all(jnp.isfinite(neighbor_map)))
    assert bool(jnp.allclose(feat, feat_r, atol=2e-2, rtol=2e-2))
    assert bool(jnp.allclose(neighbor_map, nmap_r, atol=2e-2, rtol=2e-2))
    # sigmoid outputs must be in (0, 1)
    assert bool(jnp.all((feat > 0) & (feat < 1)))
    assert bool(jnp.all((neighbor_map > 0) & (neighbor_map < 1)))

    print("KERNEL_OK")
</pallas_src>

<mosaic_0001>
module attributes {stable_mosaic.version = 11 : i64} {
  func.func @_node_decoder_kernel(%arg0: i32, %arg1: memref<256x16xf32, #tpu.memory_space<vmem>>, %arg2: memref<272x128xbf16, #tpu.memory_space<vmem>>, %arg3: memref<3x128xf32, #tpu.memory_space<vmem>>, %arg4: memref<256x128xf32, #tpu.memory_space<vmem>>) attributes {dimension_semantics = [#tpu.dimension_semantics<parallel>], iteration_bounds = array<i64: 1>, scalar_prefetch = 0 : i64, scratch_operands = 0 : i64, tpu.core_type = #tpu.core_type<tc>, window_params = [{transform_indices = @transform_0, window_bounds = array<i64: 256, 16>}, {pipeline_mode = #tpu.pipeline_mode<synchronous>, transform_indices = @transform_1, window_bounds = array<i64: 272, 128>}, {pipeline_mode = #tpu.pipeline_mode<synchronous>, transform_indices = @transform_2, window_bounds = array<i64: 3, 128>}, {transform_indices = @transform_3, window_bounds = array<i64: 256, 128>}]} {
    %c0 = arith.constant 0 : index
    %c0_0 = arith.constant 0 : index
    %0 = vector.load %arg1[%c0, %c0_0] : memref<256x16xf32, #tpu.memory_space<vmem>>, vector<256x16xf32>
    %1 = arith.truncf %0 : vector<256x16xf32> to vector<256x16xbf16>
    %c0_1 = arith.constant 0 : index
    %c0_2 = arith.constant 0 : index
    %2 = vector.load %arg2[%c0_1, %c0_2] : memref<272x128xbf16, #tpu.memory_space<vmem>>, vector<16x128xbf16>
    %c16 = arith.constant 16 : index
    %c0_3 = arith.constant 0 : index
    %3 = vector.load %arg2[%c16, %c0_3] : memref<272x128xbf16, #tpu.memory_space<vmem>>, vector<128x128xbf16>
    %c144 = arith.constant 144 : index
    %c0_4 = arith.constant 0 : index
    %4 = vector.load %arg2[%c144, %c0_4] : memref<272x128xbf16, #tpu.memory_space<vmem>>, vector<128x128xbf16>
    %c0_5 = arith.constant 0 : index
    %c0_6 = arith.constant 0 : index
    %5 = vector.load %arg3[%c0_5, %c0_6] : memref<3x128xf32, #tpu.memory_space<vmem>>, vector<3x128xf32>
    %6 = vector.extract_strided_slice %5 {offsets = [0, 0], sizes = [1, 128], strides = [1, 1]} : vector<3x128xf32> to vector<1x128xf32>
    %7 = vector.extract_strided_slice %5 {offsets = [1, 0], sizes = [1, 128], strides = [1, 1]} : vector<3x128xf32> to vector<1x128xf32>
    %8 = vector.extract_strided_slice %5 {offsets = [2, 0], sizes = [1, 128], strides = [1, 1]} : vector<3x128xf32> to vector<1x128xf32>
    %cst = arith.constant dense<0.000000e+00> : vector<256x128xf32>
    %9 = tpu.matmul %1, %2, %cst {dimension_numbers = #tpu.dot_dimension_numbers<[1], [0], [0], [1], [0, 0, 1, 1], [], []>} : vector<256x16xbf16>, vector<16x128xbf16>, vector<256x128xf32> -> vector<256x128xf32>
    %10 = vector.broadcast %6 : vector<1x128xf32> to vector<256x128xf32>
    %11 = arith.addf %9, %10 : vector<256x128xf32>
    %cst_7 = arith.constant 0.000000e+00 : f32
    %12 = vector.broadcast %cst_7 : f32 to vector<256x128xf32>
    %13 = arith.maximumf %11, %12 : vector<256x128xf32>
    %14 = arith.truncf %13 : vector<256x128xf32> to vector<256x128xbf16>
    %cst_8 = arith.constant dense<0.000000e+00> : vector<256x128xf32>
    %15 = tpu.matmul %14, %3, %cst_8 {dimension_numbers = #tpu.dot_dimension_numbers<[1], [0], [0], [1], [0, 0, 1, 1], [], []>} : vector<256x128xbf16>, vector<128x128xbf16>, vector<256x128xf32> -> vector<256x128xf32>
    %16 = vector.broadcast %7 : vector<1x128xf32> to vector<256x128xf32>
    %17 = arith.addf %15, %16 : vector<256x128xf32>
    %cst_9 = arith.constant 0.000000e+00 : f32
    %18 = vector.broadcast %cst_9 : f32 to vector<256x128xf32>
    %19 = arith.maximumf %17, %18 : vector<256x128xf32>
    %20 = arith.truncf %19 : vector<256x128xf32> to vector<256x128xbf16>
    %cst_10 = arith.constant dense<0.000000e+00> : vector<256x128xf32>
    %21 = tpu.matmul %20, %4, %cst_10 {dimension_numbers = #tpu.dot_dimension_numbers<[1], [0], [0], [1], [0, 0, 1, 1], [], []>} : vector<256x128xbf16>, vector<128x128xbf16>, vector<256x128xf32> -> vector<256x128xf32>
    %22 = vector.broadcast %8 : vector<1x128xf32> to vector<256x128xf32>
    %23 = arith.addf %21, %22 : vector<256x128xf32>
    %24 = arith.negf %23 : vector<256x128xf32>
    %25 = math.exp %24 : vector<256x128xf32>
    %cst_11 = arith.constant 1.000000e+00 : f32
    %26 = vector.broadcast %cst_11 : f32 to vector<256x128xf32>
    %27 = arith.addf %26, %25 : vector<256x128xf32>
    %28 = arith.divf %26, %27 : vector<256x128xf32>
    %c0_12 = arith.constant 0 : index
    %c0_13 = arith.constant 0 : index
    %29 = vector.load %arg4[%c0_12, %c0_13] : memref<256x128xf32, #tpu.memory_space<vmem>>, vector<256x128xf32>
    tpu.vector_store %arg4[%c0_12, %c0_13], %28 {strides = array<i32>} : memref<256x128xf32, #tpu.memory_space<vmem>>, vector<256x128xf32>,
    return
  }
  func.func @transform_0(%arg0: i32) -> (i32, i32) {
    %c0_i32 = arith.constant 0 : i32
    %c0_i32_0 = arith.constant 0 : i32
    return %arg0, %c0_i32 : i32, i32
  }
  func.func @transform_1(%arg0: i32) -> (i32, i32) {
    %c0_i32 = arith.constant 0 : i32
    %c0_i32_0 = arith.constant 0 : i32
    %c0_i32_1 = arith.constant 0 : i32
    return %c0_i32, %c0_i32_0 : i32, i32
  }
  func.func @transform_2(%arg0: i32) -> (i32, i32) {
    %c0_i32 = arith.constant 0 : i32
    %c0_i32_0 = arith.constant 0 : i32
    %c0_i32_1 = arith.constant 0 : i32
    return %c0_i32, %c0_i32_0 : i32, i32
  }
  func.func @transform_3(%arg0: i32) -> (i32, i32) {
    %c0_i32 = arith.constant 0 : i32
    %c0_i32_0 = arith.constant 0 : i32
    return %arg0, %c0_i32 : i32, i32
  }
}

</mosaic_0001>

<bundles_post_ra>
// kernel: tpu_custom_call.1
= control target key start
LH: loop header
LB: loop body
LE: loop exit
PB: predicated region body
PF: predicated region fallthrough
CT: control target
= control target key end

     0   :  { %vm109_vm0 = vcmask 130048   ;;  %s1832_s0 = inlined_call_operand.vmem [shape: f32[256,16], index: 0, kind: input, shape index: {}]   ;;  %s1833_s1 = inlined_call_operand.vmem [shape: bf16[272,128], index: 1, kind: input, shape index: {}]   ;;  %s1834_s2 = inlined_call_operand.vmem [shape: f32[3,128], index: 2, kind: input, shape index: {}]   ;;  %s1835_s3 = inlined_call_operand.hbm [shape: f32[256,128], index: 3, kind: output, shape index: {}]  }
   0x1   :  { %v1346_v0 = vld [vmem:[%s1833_s1] sm:$0xff]   ;;  %v17_v2 = vld [vmem:[%s1832_s0 + $0x8] sm:$0xff]  ;;  %v18_v3 = vld [vmem:[%s1832_s0 + $0x10] sm:$0xff] }
   0x2   :  { %v16_v1 = vld [vmem:[%s1832_s0] sm:$0xff]  ;;  %1211 = vmatprep.subr.bf16.mxu0 %v1346_v0  ;;  %v19_v5 = vld [vmem:[%s1832_s0 + $0x18] sm:$0xff]  ;;  %v21_v7 = vld [vmem:[%s1832_s0 + $0x28] sm:$0xff]  ;;  %1341 = vmatprep.subr.bf16.mxu1 %v1346_v0 }
   0x3   :  { %v48_v4 = vpack.c.bf16 %v17_v2, %v16_v1  ;;  %v20_v6 = vld [vmem:[%s1832_s0 + $0x20] sm:$0xff]  ;;  %1212 = vmatpush3.bf16.msra.mxu0 %v1346_v0  ;;  %v49_v8 = vpack.c.bf16 %v19_v5, %v18_v3  ;;  %1342 = vmatpush3.bf16.msra.mxu1 %v1346_v0  ;;  %v22_v10 = vld [vmem:[%s1832_s0 + $0x30] sm:$0xff]  ;;  %v23_v11 = vld [vmem:[%s1832_s0 + $0x38] sm:$0xff] }
   0x4   :  { %v50_v9 = vpack.c.bf16 %v21_v7, %v20_v6  ;;  %v32_v12 = vld [vmem:[%s1832_s0 + $0x80] sm:$0xff]  ;;  %v33_v13 = vld [vmem:[%s1832_s0 + $0x88] sm:$0xff]  ;;  %v34_v15 = vld [vmem:[%s1832_s0 + $0x90] sm:$0xff]  ;;  %v51_v23 = vpack.c.bf16 %v23_v11, %v22_v10 }
   0x5   :  { %1213 = vmatprep.mubr.msk.bf16.mxu0 %vm109_vm0, %v48_v4  ;;  %v56_v14 = vpack.c.bf16 %v33_v13, %v32_v12  ;;  %v35_v16 = vld [vmem:[%s1832_s0 + $0x98] sm:$0xff]  ;;  %v36_v17 = vld [vmem:[%s1832_s0 + $0xa0] sm:$0xff]  ;;  %v25_v19 = vld [vmem:[%s1832_s0 + $0x48] sm:$0xff] }
   0x6   :  { %1214 = vmatmul.mubr.msk.bf16.vlgmr.msra.gmra.mxu0 %vm109_vm0, %v49_v8  ;;  %v24_v18 = vld [vmem:[%s1832_s0 + $0x40] sm:$0xff]  ;;  %v57_v20 = vpack.c.bf16 %v35_v16, %v34_v15  ;;  %v37_v21 = vld [vmem:[%s1832_s0 + $0xa8] sm:$0xff]  ;;  %v38_v24 = vld [vmem:[%s1832_s0 + $0xb0] sm:$0xff] }
   0x7   :  { %1217 = vmatprep.mubr.msk.bf16.mxu0 %vm109_vm0, %v50_v9  ;;  %1229 = vmatprep.mubr.msk.bf16.mxu1 %vm109_vm0, %v56_v14  ;;  %v58_v22 = vpack.c.bf16 %v37_v21, %v36_v17  ;;  %v39_v25 = vld [vmem:[%s1832_s0 + $0xb8] sm:$0xff]  ;;  %v52_v26 = vpack.c.bf16 %v25_v19, %v24_v18  ;;  %v40_v27 = vld [vmem:[%s1832_s0 + $0xc0] sm:$0xff]  ;;  %v41_v28 = vld [vmem:[%s1832_s0 + $0xc8] sm:$0xff] }
   0x8   :  { %1230 = vmatmul.mubr.msk.bf16.vlgmr.msra.gmra.mxu1 %vm109_vm0, %v57_v20  ;;  %v1347_v29 = vld [vmem:[%s1833_s1 + $0x40] sm:$0xff]   ;;  %v26_v30 = vld [vmem:[%s1832_s0 + $0x50] sm:$0xff]  ;;  %v1348_v31 = vld [vmem:[%s1833_s1 + $0x38] sm:$0xff]   ;;  %v59_v33 = vpack.c.bf16 %v39_v25, %v38_v24  ;;  %v60_v35 = vpack.c.bf16 %v41_v28, %v40_v27 }
   0x9   :  { %1233 = vmatprep.mubr.msk.bf16.mxu1 %vm109_vm0, %v58_v22  ;;  %v27_v32 = vld [vmem:[%s1832_s0 + $0x58] sm:$0xff]  ;;  %1245 = vmatprep.subr.bf16.mxu1 %v1347_v29  ;;  %v28_v34 = vld [vmem:[%s1832_s0 + $0x60] sm:$0xff]  ;;  %v29_v36 = vld [vmem:[%s1832_s0 + $0x68] sm:$0xff] }
   0xa   :  { %1246 = vmatpush3.bf16.msra.mxu1 %v1347_v29  ;;  %v1349_v37 = vld [vmem:[%s1833_s1 + $0x30] sm:$0xff]   ;;  %v43_v39 = vld [vmem:[%s1832_s0 + $0xd8] sm:$0xff]  ;;  %v53_v40 = vpack.c.bf16 %v27_v32, %v26_v30  ;;  %v44_v41 = vld [vmem:[%s1832_s0 + $0xe0] sm:$0xff]  ;;  %v54_v44 = vpack.c.bf16 %v29_v36, %v28_v34 }
   0xb   :  { %1247 = vmatprep.subr.bf16.mxu1 %v1348_v31  ;;  %v42_v38 = vld [vmem:[%s1832_s0 + $0xd0] sm:$0xff]  ;;  %v45_v42 = vld [vmem:[%s1832_s0 + $0xe8] sm:$0xff]  ;;  %v31_v46 = vld [vmem:[%s1832_s0 + $0x78] sm:$0xff] }
   0xc   :  { %v1350_v43 = vld [vmem:[%s1833_s1 + $0x28] sm:$0xff]   ;;  %v30_v45 = vld [vmem:[%s1832_s0 + $0x70] sm:$0xff]  ;;  %v61_v47 = vpack.c.bf16 %v43_v39, %v42_v38  ;;  %v62_v48 = vpack.c.bf16 %v45_v42, %v44_v41  ;;  %v1351_v49 = vld [vmem:[%s1833_s1 + $0x20] sm:$0xff]  }
   0xe   :  { %1218 = vmatmul.mubr.msk.bf16.gmra.mxu0 %vm109_vm0, %v51_v23  ;;  %1248 = vmatpush3.bf16.msra.mxu1 %v1348_v31 }
   0xf   :  { %1221 = vmatprep.mubr.msk.bf16.mxu0 %vm109_vm0, %v52_v26  ;;  %1249 = vmatprep.subr.bf16.mxu1 %v1349_v37 }
  0x10   :  { %1234 = vmatmul.mubr.msk.bf16.gmra.mxu1 %vm109_vm0, %v59_v33 }
  0x11   :  { %1237 = vmatprep.mubr.msk.bf16.mxu1 %vm109_vm0, %v60_v35 }
  0x12   :  { %1250 = vmatpush3.bf16.msra.mxu1 %v1349_v37 }
  0x13   :  { %1251 = vmatprep.subr.bf16.mxu1 %v1350_v43 }
  0x16   :  { %1222 = vmatmul.mubr.msk.bf16.gmra.mxu0 %vm109_vm0, %v53_v40 }
  0x17   :  { %1225 = vmatprep.mubr.msk.bf16.mxu0 %vm109_vm0, %v54_v44 }
  0x18   :  { %8 = vsyncpa [#allocation3], 0  ;;  %v55_v50 = vpack.c.bf16 %v31_v46, %v30_v45  ;;  %1238 = vmatmul.mubr.msk.bf16.gmra.mxu1 %vm109_vm0, %v61_v47  ;;  %v46_v51 = vld [vmem:[%s1832_s0 + $0xf0] sm:$0xff]  ;;  %v47_v52 = vld [vmem:[%s1832_s0 + $0xf8] sm:$0xff]  ;;  %v99_v62 = vlaneseq }
  0x19   :  { %1241 = vmatprep.mubr.msk.bf16.mxu1 %vm109_vm0, %v62_v48  ;;  %1252 = vmatpush3.bf16.msra.mxu1 %v1350_v43  ;;  %v63_v53 = vpack.c.bf16 %v47_v52, %v46_v51  ;;  %v1352_v54 = vld [vmem:[%s1833_s1 + $0x18] sm:$0xff]   ;;  %v1353_v55 = vld [vmem:[%s1833_s1 + $0x10] sm:$0xff]   ;;  %v1354_v56 = vld [vmem:[%s1833_s1 + $0x8] sm:$0xff]  }
  0x1a   :  { %1253 = vmatprep.subr.bf16.mxu1 %v1351_v49  ;;  %v1355_v57 = vld [vmem:[%s1833_s1 + $0x80] sm:$0xff]   ;;  %v1356_v58 = vld [vmem:[%s1833_s1 + $0x78] sm:$0xff]   ;;  %v1357_v59 = vld [vmem:[%s1833_s1 + $0x70] sm:$0xff]   ;;  %v1690_v63 = vshrl.u32 %v99_v62, 7 }
  0x1b   :  { %1293 = vmatprep.subr.bf16.mxu0 %v1355_v57  ;;  %v1358_v60 = vld [vmem:[%s1833_s1 + $0x68] sm:$0xff]   ;;  %v1359_v61 = vld [vmem:[%s1833_s1 + $0x60] sm:$0xff]  }
  0x1c   :  { %1294 = vmatpush3.bf16.msra.mxu0 %v1355_v57  ;;  %v101_v0 = vsub.s32 0, %v1690_v63  ;;  %v1696_v1 = vld [vmem:[%s1834_s2] sm:$0x7] }
  0x1d   :  { %1254 = vmatpush3.bf16.msra.mxu1 %v1351_v49  ;;  %1295 = vmatprep.subr.bf16.mxu0 %v1356_v58 }
  0x1e   :  { %1226 = vmatmul.mubr.msk.bf16.gmra.mxu0 %vm109_vm0, %v55_v50  ;;  %1255 = vmatprep.subr.bf16.mxu1 %v1352_v54  ;;  %v1699_v3 = vrot.slane %v1696_v1, %v101_v0 }
  0x20   :  { %1242 = vmatmul.mubr.msk.bf16.gmra.mxu1 %vm109_vm0, %v63_v53  ;;  %1296 = vmatpush3.bf16.msra.mxu0 %v1356_v58 }
  0x21   :  { %1256 = vmatpush3.bf16.msra.mxu1 %v1352_v54  ;;  %1297 = vmatprep.subr.bf16.mxu0 %v1357_v59 }
  0x22   :  { %1257 = vmatprep.subr.bf16.mxu1 %v1353_v55 }
  0x24   :  { %1298 = vmatpush3.bf16.msra.mxu0 %v1357_v59 }
  0x25   :  { %1258 = vmatpush3.bf16.msra.mxu1 %v1353_v55  ;;  %1299 = vmatprep.subr.bf16.mxu0 %v1358_v60 }
  0x26   :  { %1259 = vmatprep.subr.bf16.mxu1 %v1354_v56 }
  0x28   :  { %1300 = vmatpush3.bf16.msra.mxu0 %v1358_v60 }
  0x29   :  { %1260 = vmatpush3.bf16.msra.mxu1 %v1354_v56  ;;  %1301 = vmatprep.subr.bf16.mxu0 %v1359_v61 }
  0x2c   :  { %1302 = vmatpush3.bf16.msra.mxu0 %v1359_v61 }
  0xc6   :  { %v1215_v2 = vpop.f32.mrf.mxu0 }
  0xc7   :  { %v201_v9 = vadd.f32 %v1215_v2, %v1699_v3 }
  0xc8   :  { %v192_v4 = vpop.f32.mrf.mxu0  ;;  %v1701_v6 = vpop.f32.mrf.mxu1 }
  0xc9   :  { %v193_v7 = vadd.f32 %v192_v4, %v1699_v3  ;;  %v321_v18 = vmax.f32 %v201_v9, 0.0 }
  0xca   :  { %v1216_v5 = vpop.f32.mrf.mxu0  ;;  %v256_v11 = vpop.f32.mrf.mxu1 }
  0xcb   :  { %v204_v8 = vadd.f32 %v1216_v5, %v1699_v3  ;;  %v319_v16 = vmax.f32 %v193_v7, 0.0  ;;  %v257_v56 = vadd.f32 %v256_v11, %v1699_v3 }
  0xcc   :  { %v195_v10 = vpop.f32.mrf.mxu0  ;;  %v1707_v15 = vpop.f32.mrf.mxu1 }
  0xcd   :  { %v196_v12 = vadd.f32 %v195_v10, %v1699_v3  ;;  %v322_v13 = vmax.f32 %v204_v8, 0.0  ;;  %v335_v4 = vmax.f32 %v257_v56, 0.0  ;;  %v369_v56 = vsub.s32 1, %v1690_v63 }
  0xce   :  { %v1219_v14 = vpop.f32.mrf.mxu0  ;;  %v259_v20 = vpop.f32.mrf.mxu1 }
  0xcf   :  { %v320_v17 = vmax.f32 %v196_v12, 0.0  ;;  %v352_v22 = vpack.c.bf16 %v322_v13, %v321_v18  ;;  %v217_v27 = vadd.f32 %v1219_v14, %v1699_v3  ;;  %v260_v57 = vadd.f32 %v259_v20, %v1699_v3 }
  0xd0   :  { %v208_v19 = vpop.f32.mrf.mxu0  ;;  %v1709_v24 = vpop.f32.mrf.mxu1  ;;  %v265_v18 = vadd.f32 %v1701_v6, %v1699_v3  ;;  %v268_v20 = vadd.f32 %v1707_v15, %v1699_v3 }
  0xd1   :  { %v351_v21 = vpack.c.bf16 %v320_v17, %v319_v16  ;;  %v209_v25 = vadd.f32 %v208_v19, %v1699_v3  ;;  %v325_v36 = vmax.f32 %v217_v27, 0.0  ;;  %v336_v7 = vmax.f32 %v260_v57, 0.0 }
  0xd2   :  { %v1220_v23 = vpop.f32.mrf.mxu0  ;;  %v272_v29 = vpop.f32.mrf.mxu1  ;;  %v281_v6 = vadd.f32 %v1709_v24, %v1699_v3 }
  0xd3   :  { %v220_v26 = vadd.f32 %v1220_v23, %v1699_v3  ;;  %1261 = vmatprep.mubr.bf16.mxu1 %v351_v21  ;;  %v323_v34 = vmax.f32 %v209_v25, 0.0  ;;  %v359_v14 = vpack.c.bf16 %v336_v7, %v335_v4  ;;  %v273_v16 = vadd.f32 %v272_v29, %v1699_v3 }
  0xd4   :  { %v211_v28 = vpop.f32.mrf.mxu0  ;;  %1262 = vmatmul.mubr.bf16.vlgmr.msra.gmra.mxu1 %v352_v22  ;;  %v1715_v33 = vpop.f32.mrf.mxu1  ;;  %v337_v25 = vmax.f32 %v265_v18, 0.0 }
  0xd5   :  { %v212_v30 = vadd.f32 %v211_v28, %v1699_v3  ;;  %v326_v31 = vmax.f32 %v220_v26, 0.0  ;;  %v339_v22 = vmax.f32 %v273_v16, 0.0  ;;  %v338_v26 = vmax.f32 %v268_v20, 0.0 }
  0xd6   :  { %v1223_v32 = vpop.f32.mrf.mxu0  ;;  %v275_v38 = vpop.f32.mrf.mxu1  ;;  %v284_v15 = vadd.f32 %v1715_v33, %v1699_v3 }
  0xd7   :  { %v324_v35 = vmax.f32 %v212_v30, 0.0  ;;  %v354_v40 = vpack.c.bf16 %v326_v31, %v325_v36  ;;  %v233_v45 = vadd.f32 %v1223_v32, %v1699_v3  ;;  %v276_v17 = vadd.f32 %v275_v38, %v1699_v3 }
  0xd8   :  { %v224_v37 = vpop.f32.mrf.mxu0  ;;  %v1717_v42 = vpop.f32.mrf.mxu1  ;;  %v360_v31 = vpack.c.bf16 %v338_v26, %v337_v25  ;;  %v341_v36 = vmax.f32 %v281_v6, 0.0 }
  0xd9   :  { %v353_v39 = vpack.c.bf16 %v324_v35, %v323_v34  ;;  %v225_v43 = vadd.f32 %v224_v37, %v1699_v3  ;;  %v329_v53 = vmax.f32 %v233_v45, 0.0  ;;  %v340_v23 = vmax.f32 %v276_v17, 0.0 }
  0xda   :  { %v1224_v41 = vpop.f32.mrf.mxu0  ;;  %v288_v50 = vpop.f32.mrf.mxu1  ;;  %v342_v37 = vmax.f32 %v284_v15, 0.0  ;;  %v297_v24 = vadd.f32 %v1717_v42, %v1699_v3  ;;  %v1360_v42 = vld [vmem:[%s1833_s1 + $0x58] sm:$0xff]  }
  0xdb   :  { %v236_v44 = vadd.f32 %v1224_v41, %v1699_v3  ;;  %1265 = vmatprep.mubr.bf16.mxu1 %v353_v39  ;;  %v327_v51 = vmax.f32 %v225_v43, 0.0  ;;  %v361_v28 = vpack.c.bf16 %v340_v23, %v339_v22  ;;  %v289_v29 = vadd.f32 %v288_v50, %v1699_v3  ;;  %1303 = vmatprep.subr.bf16.mxu0 %v1360_v42 }
  0xdc   :  { %v227_v46 = vpop.f32.mrf.mxu0  ;;  %1266 = vmatmul.mubr.bf16.gmra.mxu1 %v354_v40  ;;  %v1240_v60 = vpop.f32.mrf.mxu1  ;;  %v362_v43 = vpack.c.bf16 %v342_v37, %v341_v36  ;;  %1304 = vmatpush3.bf16.msra.mxu0 %v1360_v42 }
  0xdd   :  { %v228_v47 = vadd.f32 %v227_v46, %v1699_v3  ;;  %v330_v48 = vmax.f32 %v236_v44, 0.0  ;;  %v343_v34 = vmax.f32 %v289_v29, 0.0  ;;  %v300_v44 = vadd.f32 %v1240_v60, %v1699_v3 }
  0xde   :  { %v1227_v49 = vpop.f32.mrf.mxu0  ;;  %v291_v9 = vpop.f32.mrf.mxu1  ;;  %v345_v46 = vmax.f32 %v297_v24, 0.0 }
  0xdf   :  { %v328_v52 = vmax.f32 %v228_v47, 0.0  ;;  %v356_v58 = vpack.c.bf16 %v330_v48, %v329_v53  ;;  %v249_v0 = vadd.f32 %v1227_v49, %v1699_v3  ;;  %v292_v30 = vadd.f32 %v291_v9, %v1699_v3 }
  0xe0   :  { %v240_v54 = vpop.f32.mrf.mxu0  ;;  %v1243_v21 = vpop.f32.mrf.mxu1  ;;  %v346_v47 = vmax.f32 %v300_v44, 0.0 }
  0xe1   :  { %v355_v55 = vpack.c.bf16 %v328_v52, %v327_v51  ;;  %v241_v61 = vadd.f32 %v240_v54, %v1699_v3  ;;  %v333_v12 = vmax.f32 %v249_v0, 0.0  ;;  %v344_v35 = vmax.f32 %v292_v30, 0.0 }
  0xe2   :  { %v1228_v59 = vpop.f32.mrf.mxu0  ;;  %v304_v27 = vpop.f32.mrf.mxu1  ;;  %v364_v49 = vpack.c.bf16 %v346_v47, %v345_v46  ;;  %v313_v50 = vadd.f32 %v1243_v21, %v1699_v3 }
  0xe3   :  { %v252_v62 = vadd.f32 %v1228_v59, %v1699_v3  ;;  %1269 = vmatprep.mubr.bf16.mxu1 %v355_v55  ;;  %v331_v10 = vmax.f32 %v241_v61, 0.0  ;;  %v363_v39 = vpack.c.bf16 %v344_v35, %v343_v34  ;;  %v305_v40 = vadd.f32 %v304_v27, %v1699_v3  ;;  %v1361_v55 = vld [vmem:[%s1833_s1 + $0x50] sm:$0xff]  }
  0xe4   :  { %v243_v2 = vpop.f32.mrf.mxu0  ;;  %1270 = vmatmul.mubr.bf16.gmra.mxu1 %v356_v58  ;;  %v1244_v32 = vpop.f32.mrf.mxu1  ;;  %v349_v52 = vmax.f32 %v313_v50, 0.0  ;;  %1305 = vmatprep.subr.bf16.mxu0 %v1361_v55  ;;  %v1759_v58 = vrot.slane %v1696_v1, %v369_v56 }
  0xe5   :  { %v244_v5 = vadd.f32 %v243_v2, %v1699_v3  ;;  %v334_v8 = vmax.f32 %v252_v62, 0.0  ;;  %v347_v33 = vmax.f32 %v305_v40, 0.0  ;;  %v316_v51 = vadd.f32 %v1244_v32, %v1699_v3  ;;  %1306 = vmatpush3.bf16.msra.mxu0 %v1361_v55 }
  0xe6   :  { %v307_v38 = vpop.f32.mrf.mxu1 }
  0xe7   :  { %v332_v11 = vmax.f32 %v244_v5, 0.0  ;;  %v358_v19 = vpack.c.bf16 %v334_v8, %v333_v12  ;;  %v308_v41 = vadd.f32 %v307_v38, %v1699_v3  ;;  %v350_v53 = vmax.f32 %v316_v51, 0.0  ;;  %v1362_v3 = vld [vmem:[%s1833_s1 + $0x48] sm:$0xff]   ;;  %s1513_s1 = smov [#allocation2]  }
  0xe8   :  { %1307 = vmatprep.subr.bf16.mxu0 %v1362_v3  ;;  %s1070_s29 = sshll.u32 %s1513_s1, 4  ;;  %s1071_s29 = int_to_ptr.vmem [resolvable:$true] %s1070_s29 }
  0xe9   :  { %v357_v13 = vpack.c.bf16 %v332_v11, %v331_v10  ;;  %v348_v45 = vmax.f32 %v308_v41, 0.0  ;;  %v366_v54 = vpack.c.bf16 %v350_v53, %v349_v52  ;;  %1308 = vmatpush3.bf16.msra.mxu0 %v1362_v3  ;;  %s1491_s30 = scalar_lea.vmem %s1071_s29, 4096  ;;  %p1496_p1 = scmp.lt.s32.totalorder %s1071_s29, %s1071_s29 }
  0xea   :  { %p1492_p0 = scmp.ne.s32.totalorder %s1071_s29, %s1491_s30  ;;  %p1497_p2 = scmp.lt.s32.totalorder %s1491_s30, %s1491_s30 }
  0xeb   :  { %1273 = vmatprep.mubr.bf16.mxu1 %v357_v13  ;;  %v365_v48 = vpack.c.bf16 %v348_v45, %v347_v33 }
  0xec   :  { %1274 = vmatmul.mubr.bf16.gmra.mxu1 %v358_v19  ;;  %p1498_p3 = por %p1497_p2, %p1496_p1 }
  0xed   :  { %1277 = vmatprep.mubr.bf16.mxu1 %v359_v14 }
  0xee   :  { %p1499_p4 = pnand %p1498_p3, %p1492_p0 }
  0xf4   :  { %1278 = vmatmul.mubr.bf16.gmra.mxu1 %v360_v31 }
  0xf5   :  { %1281 = vmatprep.mubr.bf16.mxu1 %v361_v28 }
  0xfc   :  { %1282 = vmatmul.mubr.bf16.gmra.mxu1 %v362_v43 }
  0xfd   :  { %1285 = vmatprep.mubr.bf16.mxu1 %v363_v39 }
 0x104   :  { %1286 = vmatmul.mubr.bf16.gmra.mxu1 %v364_v49 }
 0x105   :  { %1289 = vmatprep.mubr.bf16.mxu1 %v365_v48 }
 0x10c   :  { %1290 = vmatmul.mubr.bf16.gmra.mxu1 %v366_v54 }
 0x194   :  { %v1263_v57 = vpop.f32.mrf.mxu1 }
 0x195   :  { %v462_v0 = vadd.f32 %v1263_v57, %v1759_v58 }
 0x196   :  { %v453_v59 = vpop.f32.mrf.mxu1 }
 0x197   :  { %v454_v61 = vadd.f32 %v453_v59, %v1759_v58  ;;  %v582_v10 = vmax.f32 %v462_v0, 0.0 }
 0x198   :  { %v1264_v60 = vpop.f32.mrf.mxu1 }
 0x199   :  { %v465_v62 = vadd.f32 %v1264_v60, %v1759_v58  ;;  %v580_v8 = vmax.f32 %v454_v61, 0.0 }
 0x19a   :  { %v456_v2 = vpop.f32.mrf.mxu1 }
 0x19b   :  { %v457_v4 = vadd.f32 %v456_v2, %v1759_v58  ;;  %v583_v5 = vmax.f32 %v465_v62, 0.0 }
 0x19c   :  { %v1267_v7 = vpop.f32.mrf.mxu1 }
 0x19d   :  { %v581_v9 = vmax.f32 %v457_v4, 0.0  ;;  %v613_v13 = vpack.c.bf16 %v583_v5, %v582_v10  ;;  %v478_v18 = vadd.f32 %v1267_v7, %v1759_v58 }
 0x19e   :  { %v469_v11 = vpop.f32.mrf.mxu1 }
 0x19f   :  { %v612_v12 = vpack.c.bf16 %v581_v9, %v580_v8  ;;  %v470_v16 = vadd.f32 %v469_v11, %v1759_v58  ;;  %v586_v26 = vmax.f32 %v478_v18, 0.0 }
 0x1a0   :  { %v1268_v14 = vpop.f32.mrf.mxu1 }
 0x1a1   :  { %v481_v17 = vadd.f32 %v1268_v14, %v1759_v58  ;;  %1309 = vmatprep.mubr.bf16.mxu0 %v612_v12  ;;  %v584_v23 = vmax.f32 %v470_v16, 0.0 }
 0x1a2   :  { %v472_v19 = vpop.f32.mrf.mxu1  ;;  %1310 = vmatmul.mubr.bf16.vlgmr.msra.gmra.mxu0 %v613_v13 }
 0x1a3   :  { %v473_v20 = vadd.f32 %v472_v19, %v1759_v58  ;;  %v587_v21 = vmax.f32 %v481_v17, 0.0 }
 0x1a4   :  { %v1271_v22 = vpop.f32.mrf.mxu1 }
 0x1a5   :  { %v585_v25 = vmax.f32 %v473_v20, 0.0  ;;  %v615_v29 = vpack.c.bf16 %v587_v21, %v586_v26  ;;  %v494_v15 = vadd.f32 %v1271_v22, %v1759_v58 }
 0x1a6   :  { %v485_v27 = vpop.f32.mrf.mxu1 }
 0x1a7   :  { %v614_v28 = vpack.c.bf16 %v585_v25, %v584_v23  ;;  %v486_v31 = vadd.f32 %v485_v27, %v1759_v58  ;;  %v590_v39 = vmax.f32 %v494_v15, 0.0 }
 0x1a8   :  { %v1272_v30 = vpop.f32.mrf.mxu1 }
 0x1a9   :  { %v497_v6 = vadd.f32 %v1272_v30, %v1759_v58  ;;  %1313 = vmatprep.mubr.bf16.mxu0 %v614_v28  ;;  %v588_v37 = vmax.f32 %v486_v31, 0.0 }
 0x1aa   :  { %v488_v32 = vpop.f32.mrf.mxu1  ;;  %1314 = vmatmul.mubr.bf16.gmra.mxu0 %v615_v29 }
 0x1ab   :  { %v489_v34 = vadd.f32 %v488_v32, %v1759_v58  ;;  %v591_v35 = vmax.f32 %v497_v6, 0.0 }
 0x1ac   :  { %v1275_v36 = vpop.f32.mrf.mxu1 }
 0x1ad   :  { %v589_v38 = vmax.f32 %v489_v34, 0.0  ;;  %v617_v43 = vpack.c.bf16 %v591_v35, %v590_v39  ;;  %v510_v45 = vadd.f32 %v1275_v36, %v1759_v58 }
 0x1ae   :  { %v501_v40 = vpop.f32.mrf.mxu1 }
 0x1af   :  { %v616_v41 = vpack.c.bf16 %v589_v38, %v588_v37  ;;  %v502_v44 = vadd.f32 %v501_v40, %v1759_v58  ;;  %v594_v52 = vmax.f32 %v510_v45, 0.0 }
 0x1b0   :  { %v1276_v24 = vpop.f32.mrf.mxu1 }
 0x1b1   :  { %v513_v33 = vadd.f32 %v1276_v24, %v1759_v58  ;;  %1317 = vmatprep.mubr.bf16.mxu0 %v616_v41  ;;  %v592_v50 = vmax.f32 %v502_v44, 0.0 }
 0x1b2   :  { %v504_v46 = vpop.f32.mrf.mxu1  ;;  %1318 = vmatmul.mubr.bf16.gmra.mxu0 %v617_v43 }
 0x1b3   :  { %v505_v47 = vadd.f32 %v504_v46, %v1759_v58  ;;  %v595_v48 = vmax.f32 %v513_v33, 0.0 }
 0x1b4   :  { %v1279_v49 = vpop.f32.mrf.mxu1 }
 0x1b5   :  { %v593_v51 = vmax.f32 %v505_v47, 0.0  ;;  %v619_v42 = vpack.c.bf16 %v595_v48, %v594_v52  ;;  %v526_v57 = vadd.f32 %v1279_v49, %v1759_v58  ;;  %v630_v49 = vsub.s32 2, %v1690_v63 }
 0x1b6   :  { %v517_v53 = vpop.f32.mrf.mxu1 }
 0x1b7   :  { %v618_v54 = vpack.c.bf16 %v593_v51, %v592_v50  ;;  %v518_v3 = vadd.f32 %v517_v53, %v1759_v58  ;;  %v598_v4 = vmax.f32 %v526_v57, 0.0  ;;  %v1795_v50 = vrot.slane %v1696_v1, %v630_v49 }
 0x1b8   :  { %v1280_v55 = vpop.f32.mrf.mxu1 }
 0x1b9   :  { %v529_v56 = vadd.f32 %v1280_v55, %v1759_v58  ;;  %1321 = vmatprep.mubr.bf16.mxu0 %v618_v54  ;;  %v596_v0 = vmax.f32 %v518_v3, 0.0 }
 0x1ba   :  { %v520_v59 = vpop.f32.mrf.mxu1  ;;  %1322 = vmatmul.mubr.bf16.gmra.mxu0 %v619_v42 }
 0x1bb   :  { %v521_v60 = vadd.f32 %v520_v59, %v1759_v58  ;;  %v599_v61 = vmax.f32 %v529_v56, 0.0 }
 0x1bc   :  { %v1283_v62 = vpop.f32.mrf.mxu1 }
 0x1bd   :  { %v597_v2 = vmax.f32 %v521_v60, 0.0  ;;  %v621_v8 = vpack.c.bf16 %v599_v61, %v598_v4  ;;  %v542_v12 = vadd.f32 %v1283_v62, %v1759_v58 }
 0x1be   :  { %v533_v5 = vpop.f32.mrf.mxu1 }
 0x1bf   :  { %v620_v7 = vpack.c.bf16 %v597_v2, %v596_v0  ;;  %v534_v10 = vadd.f32 %v533_v5, %v1759_v58  ;;  %v602_v20 = vmax.f32 %v542_v12, 0.0 }
 0x1c0   :  { %v1284_v9 = vpop.f32.mrf.mxu1 }
 0x1c1   :  { %v545_v11 = vadd.f32 %v1284_v9, %v1759_v58  ;;  %1325 = vmatprep.mubr.bf16.mxu0 %v620_v7  ;;  %v600_v18 = vmax.f32 %v534_v10, 0.0 }
 0x1c2   :  { %v536_v13 = vpop.f32.mrf.mxu1  ;;  %1326 = vmatmul.mubr.bf16.gmra.mxu0 %v621_v8 }
 0x1c3   :  { %v537_v14 = vadd.f32 %v536_v13, %v1759_v58  ;;  %v603_v16 = vmax.f32 %v545_v11, 0.0 }
 0x1c4   :  { %v1287_v17 = vpop.f32.mrf.mxu1 }
 0x1c5   :  { %v601_v19 = vmax.f32 %v537_v14, 0.0  ;;  %v623_v23 = vpack.c.bf16 %v603_v16, %v602_v20  ;;  %v558_v28 = vadd.f32 %v1287_v17, %v1759_v58 }
 0x1c6   :  { %v549_v21 = vpop.f32.mrf.mxu1 }
 0x1c7   :  { %v622_v22 = vpack.c.bf16 %v601_v19, %v600_v18  ;;  %v550_v26 = vadd.f32 %v549_v21, %v1759_v58  ;;  %v606_v34 = vmax.f32 %v558_v28, 0.0 }
 0x1c8   :  { %v1288_v25 = vpop.f32.mrf.mxu1 }
 0x1c9   :  { %v561_v27 = vadd.f32 %v1288_v25, %v1759_v58  ;;  %1329 = vmatprep.mubr.bf16.mxu0 %v622_v22  ;;  %v604_v15 = vmax.f32 %v550_v26, 0.0 }
 0x1ca   :  { %v552_v29 = vpop.f32.mrf.mxu1  ;;  %1330 = vmatmul.mubr.bf16.gmra.mxu0 %v623_v23 }
 0x1cb   :  { %v553_v30 = vadd.f32 %v552_v29, %v1759_v58  ;;  %v607_v31 = vmax.f32 %v561_v27, 0.0 }
 0x1cc   :  { %v1291_v6 = vpop.f32.mrf.mxu1 }
 0x1cd   :  { %v605_v32 = vmax.f32 %v553_v30, 0.0  ;;  %v625_v37 = vpack.c.bf16 %v607_v31, %v606_v34  ;;  %v574_v41 = vadd.f32 %v1291_v6, %v1759_v58 }
 0x1ce   :  { %v565_v35 = vpop.f32.mrf.mxu1 }
 0x1cf   :  { %v624_v36 = vpack.c.bf16 %v605_v32, %v604_v15  ;;  %v566_v39 = vadd.f32 %v565_v35, %v1759_v58  ;;  %v610_v46 = vmax.f32 %v574_v41, 0.0 }
 0x1d0   :  { %v1292_v38 = vpop.f32.mrf.mxu1 }
 0x1d1   :  { %v577_v40 = vadd.f32 %v1292_v38, %v1759_v58  ;;  %1333 = vmatprep.mubr.bf16.mxu0 %v624_v36  ;;  %v608_v33 = vmax.f32 %v566_v39, 0.0 }
 0x1d2   :  { %v568_v43 = vpop.f32.mrf.mxu1  ;;  %1334 = vmatmul.mubr.bf16.gmra.mxu0 %v625_v37 }
 0x1d3   :  { %v569_v24 = vadd.f32 %v568_v43, %v1759_v58  ;;  %v611_v44 = vmax.f32 %v577_v40, 0.0 }
 0x1d5   :  { %v609_v45 = vmax.f32 %v569_v24, 0.0  ;;  %v627_v48 = vpack.c.bf16 %v611_v44, %v610_v46 }
 0x1d7   :  { %v626_v47 = vpack.c.bf16 %v609_v45, %v608_v33 }
 0x1d9   :  { %1337 = vmatprep.mubr.bf16.mxu0 %v626_v47 }
 0x1da   :  { %1338 = vmatmul.mubr.bf16.gmra.mxu0 %v627_v48 }
 0x262   :  { %v1311_v51 = vpop.f32.mrf.mxu0 }
 0x263   :  { %v723_v52 = vadd.f32 %v1311_v51, %v1795_v50 }
 0x264   :  { %v714_v53 = vpop.f32.mrf.mxu0 }
 0x265   :  { %v1116_v54 = vmul.f32 -1.442695, %v723_v52  ;;  %v715_v58 = vadd.f32 %v714_v53, %v1795_v50 }
 0x266   :  { %v1312_v42 = vpop.f32.mrf.mxu0 }
 0x267   :  { %1363 = vpow2.f32 %v1116_v54  ;;  %v1114_v55 = vmul.f32 -1.442695, %v715_v58  ;;  %v726_v3 = vadd.f32 %v1312_v42, %v1795_v50 }
 0x268   :  { %v717_v56 = vpop.f32.mrf.mxu0 }
 0x269   :  { %1365 = vpow2.f32 %v1114_v55  ;;  %v1117_v57 = vmul.f32 -1.442695, %v726_v3  ;;  %v718_v63 = vadd.f32 %v717_v56, %v1795_v50 }
 0x26a   :  { %v1315_v59 = vpop.f32.mrf.mxu0 }
 0x26b   :  { %1367 = vpow2.f32 %v1117_v57  ;;  %v1115_v1 = vmul.f32 -1.442695, %v718_v63  ;;  %v739_v60 = vadd.f32 %v1315_v59, %v1795_v50 }
 0x26c   :  { %v730_v61 = vpop.f32.mrf.mxu0 }
 0x26d   :  { %1369 = vpow2.f32 %v1115_v1  ;;  %v1120_v62 = vmul.f32 -1.442695, %v739_v60  ;;  %v731_v0 = vadd.f32 %v730_v61, %v1795_v50 }
 0x26e   :  { %v1316_v2 = vpop.f32.mrf.mxu0 }
 0x26f   :  { %1371 = vpow2.f32 %v1120_v62  ;;  %v1118_v4 = vmul.f32 -1.442695, %v731_v0  ;;  %v742_v5 = vadd.f32 %v1316_v2, %v1795_v50 }
 0x270   :  { %v733_v7 = vpop.f32.mrf.mxu0 }
 0x271   :  { %1373 = vpow2.f32 %v1118_v4  ;;  %v1121_v8 = vmul.f32 -1.442695, %v742_v5  ;;  %v734_v9 = vadd.f32 %v733_v7, %v1795_v50 }
 0x272   :  { %v1319_v10 = vpop.f32.mrf.mxu0 }
 0x273   :  { %1375 = vpow2.f32 %v1121_v8  ;;  %v1119_v11 = vmul.f32 -1.442695, %v734_v9  ;;  %v755_v12 = vadd.f32 %v1319_v10, %v1795_v50 }
 0x274   :  { %v1364_v13 = vpop.eup %1363  ;;  %v746_v14 = vpop.f32.mrf.mxu0 }
 0x275   :  { %v939_v16 = vadd.f32 1.0, %v1364_v13  ;;  %1377 = vpow2.f32 %v1119_v11  ;;  %v1124_v17 = vmul.f32 -1.442695, %v755_v12  ;;  %v747_v18 = vadd.f32 %v746_v14, %v1795_v50 }
 0x276   :  { %v1366_v19 = vpop.eup %1365  ;;  %v1320_v20 = vpop.f32.mrf.mxu0 }
 0x277   :  { %1379 = vrcp.f32 %v939_v16  ;;  %v937_v21 = vadd.f32 1.0, %v1366_v19  ;;  %v1122_v22 = vmul.f32 -1.442695, %v747_v18  ;;  %v758_v23 = vadd.f32 %v1320_v20, %v1795_v50 }
 0x278   :  { %v1368_v25 = vpop.eup %1367  ;;  %1381 = vpow2.f32 %v1124_v17  ;;  %v749_v26 = vpop.f32.mrf.mxu0 }
 0x279   :  { %1383 = vrcp.f32 %v937_v21  ;;  %v940_v27 = vadd.f32 1.0, %v1368_v25  ;;  %v1125_v28 = vmul.f32 -1.442695, %v758_v23  ;;  %v750_v29 = vadd.f32 %v749_v26, %v1795_v50 }
 0x27a   :  { %v1370_v30 = vpop.eup %1369  ;;  %1385 = vpow2.f32 %v1122_v22  ;;  %v1323_v31 = vpop.f32.mrf.mxu0 }
 0x27b   :  { %1387 = vrcp.f32 %v940_v27  ;;  %v938_v6 = vadd.f32 1.0, %v1370_v30  ;;  %v1123_v15 = vmul.f32 -1.442695, %v750_v29  ;;  %v771_v32 = vadd.f32 %v1323_v31, %v1795_v50 }
 0x27c   :  { %v1372_v34 = vpop.eup %1371  ;;  %1389 = vpow2.f32 %v1125_v28  ;;  %v762_v35 = vpop.f32.mrf.mxu0 }
 0x27d   :  { %1391 = vrcp.f32 %v938_v6  ;;  %v943_v36 = vadd.f32 1.0, %v1372_v34  ;;  %v1128_v37 = vmul.f32 -1.442695, %v771_v32  ;;  %v763_v38 = vadd.f32 %v762_v35, %v1795_v50 }
 0x27e   :  { %v1374_v39 = vpop.eup %1373  ;;  %1393 = vpow2.f32 %v1123_v15  ;;  %v1324_v40 = vpop.f32.mrf.mxu0 }
 0x27f   :  { %1395 = vrcp.f32 %v943_v36  ;;  %v941_v41 = vadd.f32 1.0, %v1374_v39  ;;  %v1126_v43 = vmul.f32 -1.442695, %v763_v38  ;;  %v774_v24 = vadd.f32 %v1324_v40, %v1795_v50 }
 0x280   :  { %v1376_v44 = vpop.eup %1375  ;;  %1397 = vpow2.f32 %v1128_v37  ;;  %v765_v33 = vpop.f32.mrf.mxu0 }
 0x281   :  { %1399 = vrcp.f32 %v941_v41  ;;  %v944_v45 = vadd.f32 1.0, %v1376_v44  ;;  %v1129_v46 = vmul.f32 -1.442695, %v774_v24  ;;  %v766_v47 = vadd.f32 %v765_v33, %v1795_v50 }
 0x282   :  { %v1378_v48 = vpop.eup %1377  ;;  %1401 = vpow2.f32 %v1126_v43  ;;  %v1327_v49 = vpop.f32.mrf.mxu0 }
 0x283   :  { %1403 = vrcp.f32 %v944_v45  ;;  %v942_v51 = vadd.f32 1.0, %v1378_v48  ;;  %v1127_v52 = vmul.f32 -1.442695, %v766_v47  ;;  %v787_v53 = vadd.f32 %v1327_v49, %v1795_v50 }
 0x284   :  { %v1380_v54 = vpop.eup %1379  ;;  %1405 = vpow2.f32 %v1129_v46  ;;  %v778_v58 = vpop.f32.mrf.mxu0 }
 0x285   :  { %v1382_v42 = vpop.eup %1381  ;;  %1035 = vst [vmem:[#allocation2 + $0x10] sm:$0xff] %v1380_v54  ;;  %1407 = vrcp.f32 %v942_v51  ;;  %v1132_v55 = vmul.f32 -1.442695, %v787_v53  ;;  %v779_v3 = vadd.f32 %v778_v58, %v1795_v50 }
 0x286   :  { %v1384_v56 = vpop.eup %1383  ;;  %v947_v57 = vadd.f32 1.0, %v1382_v42  ;;  %1409 = vpow2.f32 %v1127_v52  ;;  %v1328_v63 = vpop.f32.mrf.mxu0 }
 0x287   :  { %v1386_v59 = vpop.eup %1385  ;;  %1033 = vst [vmem:[#allocation2] sm:$0xff] %v1384_v56  ;;  %1411 = vpow2.f32 %v1132_v55  ;;  %v1130_v1 = vmul.f32 -1.442695, %v779_v3  ;;  %v790_v60 = vadd.f32 %v1328_v63, %v1795_v50 }
 0x288   :  { %v1388_v61 = vpop.eup %1387  ;;  %1413 = vrcp.f32 %v947_v57  ;;  %v945_v62 = vadd.f32 1.0, %v1386_v59  ;;  %v781_v0 = vpop.f32.mrf.mxu0 }
 0x289   :  { %v1390_v2 = vpop.eup %1389  ;;  %1036 = vst [vmem:[#allocation2 + $0x18] sm:$0xff] %v1388_v61  ;;  %1415 = vpow2.f32 %v1130_v1  ;;  %v1133_v4 = vmul.f32 -1.442695, %v790_v60  ;;  %v782_v5 = vadd.f32 %v781_v0, %v1795_v50 }
 0x28a   :  { %v1392_v7 = vpop.eup %1391  ;;  %1417 = vrcp.f32 %v945_v62  ;;  %v948_v8 = vadd.f32 1.0, %v1390_v2  ;;  %v1331_v9 = vpop.f32.mrf.mxu0 }
 0x28b   :  { %v1394_v10 = vpop.eup %1393  ;;  %1034 = vst [vmem:[#allocation2 + $0x8] sm:$0xff] %v1392_v7  ;;  %1419 = vpow2.f32 %v1133_v4  ;;  %v1131_v11 = vmul.f32 -1.442695, %v782_v5  ;;  %v803_v12 = vadd.f32 %v1331_v9, %v1795_v50 }
 0x28c   :  { %v1396_v13 = vpop.eup %1395  ;;  %1421 = vrcp.f32 %v948_v8  ;;  %v946_v14 = vadd.f32 1.0, %v1394_v10  ;;  %v794_v16 = vpop.f32.mrf.mxu0 }
 0x28d   :  { %v1398_v17 = vpop.eup %1397  ;;  %1039 = vst [vmem:[#allocation2 + $0x30] sm:$0xff] %v1396_v13  ;;  %1423 = vpow2.f32 %v1131_v11  ;;  %v1136_v18 = vmul.f32 -1.442695, %v803_v12  ;;  %v795_v19 = vadd.f32 %v794_v16, %v1795_v50 }
 0x28e   :  { %v1400_v20 = vpop.eup %1399  ;;  %1425 = vrcp.f32 %v946_v14  ;;  %v951_v21 = vadd.f32 1.0, %v1398_v17  ;;  %v1332_v22 = vpop.f32.mrf.mxu0 }
 0x28f   :  { %v1402_v23 = vpop.eup %1401  ;;  %1037 = vst [vmem:[#allocation2 + $0x20] sm:$0xff] %v1400_v20  ;;  %1427 = vpow2.f32 %v1136_v18  ;;  %v1134_v25 = vmul.f32 -1.442695, %v795_v19  ;;  %v806_v26 = vadd.f32 %v1332_v22, %v1795_v50 }
 0x290   :  { %v1404_v27 = vpop.eup %1403  ;;  %1429 = vrcp.f32 %v951_v21  ;;  %v949_v28 = vadd.f32 1.0, %v1402_v23  ;;  %v797_v29 = vpop.f32.mrf.mxu0 }
 0x291   :  { %v1406_v30 = vpop.eup %1405  ;;  %1040 = vst [vmem:[#allocation2 + $0x38] sm:$0xff] %v1404_v27  ;;  %1431 = vpow2.f32 %v1134_v25  ;;  %v1137_v31 = vmul.f32 -1.442695, %v806_v26  ;;  %v798_v6 = vadd.f32 %v797_v29, %v1795_v50 }
 0x292   :  { %v1408_v15 = vpop.eup %1407  ;;  %1433 = vrcp.f32 %v949_v28  ;;  %v952_v32 = vadd.f32 1.0, %v1406_v30  ;;  %v1335_v34 = vpop.f32.mrf.mxu0 }
 0x293   :  { %v1410_v35 = vpop.eup %1409  ;;  %1038 = vst [vmem:[#allocation2 + $0x28] sm:$0xff] %v1408_v15  ;;  %1435 = vpow2.f32 %v1137_v31  ;;  %v1135_v36 = vmul.f32 -1.442695, %v798_v6  ;;  %v819_v37 = vadd.f32 %v1335_v34, %v1795_v50 }
 0x294   :  { %v1412_v38 = vpop.eup %1411  ;;  %1437 = vrcp.f32 %v952_v32  ;;  %v950_v39 = vadd.f32 1.0, %v1410_v35  ;;  %v810_v40 = vpop.f32.mrf.mxu0 }
 0x295   :  { %v1414_v41 = vpop.eup %1413  ;;  %v955_v43 = vadd.f32 1.0, %v1412_v38  ;;  %1439 = vpow2.f32 %v1135_v36  ;;  %v1140_v24 = vmul.f32 -1.442695, %v819_v37  ;;  %v811_v44 = vadd.f32 %v810_v40, %v1795_v50 }
 0x296   :  { %v1416_v33 = vpop.eup %1415  ;;  %1043 = vst [vmem:[#allocation2 + $0x50] sm:$0xff] %v1414_v41  ;;  %1441 = vrcp.f32 %v950_v39  ;;  %v1336_v45 = vpop.f32.mrf.mxu0 }
 0x297   :  { %v1418_v46 = vpop.eup %1417  ;;  %1443 = vrcp.f32 %v955_v43  ;;  %v953_v47 = vadd.f32 1.0, %v1416_v33  ;;  %v1138_v48 = vmul.f32 -1.442695, %v811_v44  ;;  %v822_v49 = vadd.f32 %v1336_v45, %v1795_v50 }
 0x298   :  { %v1420_v51 = vpop.eup %1419  ;;  %1041 = vst [vmem:[#allocation2 + $0x40] sm:$0xff] %v1418_v46  ;;  %1445 = vpow2.f32 %v1140_v24  ;;  %v813_v52 = vpop.f32.mrf.mxu0 }
 0x299   :  { %v1422_v53 = vpop.eup %1421  ;;  %1447 = vrcp.f32 %v953_v47  ;;  %v956_v54 = vadd.f32 1.0, %v1420_v51  ;;  %v1141_v58 = vmul.f32 -1.442695, %v822_v49  ;;  %v814_v42 = vadd.f32 %v813_v52, %v1795_v50 }
 0x29a   :  { %v1424_v55 = vpop.eup %1423  ;;  %1044 = vst [vmem:[#allocation2 + $0x58] sm:$0xff] %v1422_v53  ;;  %1449 = vpow2.f32 %v1138_v48  ;;  %v1339_v3 = vpop.f32.mrf.mxu0 }
 0x29b   :  { %v1426_v56 = vpop.eup %1425  ;;  %1451 = vrcp.f32 %v956_v54  ;;  %v954_v57 = vadd.f32 1.0, %v1424_v55  ;;  %v1139_v63 = vmul.f32 -1.442695, %v814_v42  ;;  %v835_v59 = vadd.f32 %v1339_v3, %v1795_v50 }
 0x29c   :  { %v1428_v1 = vpop.eup %1427  ;;  %1042 = vst [vmem:[#allocation2 + $0x48] sm:$0xff] %v1426_v56  ;;  %1453 = vpow2.f32 %v1141_v58  ;;  %v826_v60 = vpop.f32.mrf.mxu0 }
 0x29d   :  { %v1430_v61 = vpop.eup %1429  ;;  %1455 = vrcp.f32 %v954_v57  ;;  %v959_v62 = vadd.f32 1.0, %v1428_v1  ;;  %v1144_v0 = vmul.f32 -1.442695, %v835_v59  ;;  %v827_v2 = vadd.f32 %v826_v60, %v1795_v50 }
 0x29e   :  { %v1432_v4 = vpop.eup %1431  ;;  %1047 = vst [vmem:[#allocation2 + $0x70] sm:$0xff] %v1430_v61  ;;  %1457 = vpow2.f32 %v1139_v63  ;;  %v1340_v5 = vpop.f32.mrf.mxu0 }
 0x29f   :  { %v1434_v7 = vpop.eup %1433  ;;  %1459 = vrcp.f32 %v959_v62  ;;  %v957_v8 = vadd.f32 1.0, %v1432_v4  ;;  %v1142_v9 = vmul.f32 -1.442695, %v827_v2  ;;  %v838_v10 = vadd.f32 %v1340_v5, %v1795_v50 }
 0x2a0   :  { %v1436_v11 = vpop.eup %1435  ;;  %1045 = vst [vmem:[#allocation2 + $0x60] sm:$0xff] %v1434_v7  ;;  %1461 = vpow2.f32 %v1144_v0  ;;  %v829_v12 = vpop.f32.mrf.mxu0 }
 0x2a1   :  { %v1438_v13 = vpop.eup %1437  ;;  %1463 = vrcp.f32 %v957_v8  ;;  %v960_v14 = vadd.f32 1.0, %v1436_v11  ;;  %v1145_v16 = vmul.f32 -1.442695, %v838_v10  ;;  %v830_v17 = vadd.f32 %v829_v12, %v1795_v50 }
 0x2a2   :  { %v1440_v18 = vpop.eup %1439  ;;  %1048 = vst [vmem:[#allocation2 + $0x78] sm:$0xff] %v1438_v13  ;;  %1465 = vpow2.f32 %v1142_v9 }
 0x2a3   :  { %v1442_v19 = vpop.eup %1441  ;;  %1467 = vrcp.f32 %v960_v14  ;;  %v958_v20 = vadd.f32 1.0, %v1440_v18  ;;  %v1143_v21 = vmul.f32 -1.442695, %v830_v17 }
 0x2a4   :  { %v1444_v22 = vpop.eup %1443  ;;  %1046 = vst [vmem:[#allocation2 + $0x68] sm:$0xff] %v1442_v19  ;;  %1469 = vpow2.f32 %v1145_v16 }
 0x2a5   :  { %v1446_v23 = vpop.eup %1445  ;;  %1051 = vst [vmem:[#allocation2 + $0x90] sm:$0xff] %v1444_v22  ;;  %1471 = vrcp.f32 %v958_v20 }
 0x2a6   :  { %v1448_v25 = vpop.eup %1447  ;;  %v963_v26 = vadd.f32 1.0, %v1446_v23  ;;  %1473 = vpow2.f32 %v1143_v21 }
 0x2a7   :  { %v1450_v27 = vpop.eup %1449  ;;  %1049 = vst [vmem:[#allocation2 + $0x80] sm:$0xff] %v1448_v25 }
 0x2a8   :  { %v1452_v28 = vpop.eup %1451  ;;  %1475 = vrcp.f32 %v963_v26  ;;  %v961_v50 = vadd.f32 1.0, %v1450_v27 }
 0x2a9   :  { %v1454_v29 = vpop.eup %1453  ;;  %1052 = vst [vmem:[#allocation2 + $0x98] sm:$0xff] %v1452_v28 }
 0x2aa   :  { %v1456_v30 = vpop.eup %1455  ;;  %1477 = vrcp.f32 %v961_v50  ;;  %v964_v31 = vadd.f32 1.0, %v1454_v29 }
 0x2ab   :  { %v1458_v6 = vpop.eup %1457  ;;  %1050 = vst [vmem:[#allocation2 + $0x88] sm:$0xff] %v1456_v30 }
 0x2ac   :  { %v1460_v15 = vpop.eup %1459  ;;  %1479 = vrcp.f32 %v964_v31  ;;  %v962_v32 = vadd.f32 1.0, %v1458_v6 }
 0x2ad   :  { %v1462_v34 = vpop.eup %1461  ;;  %1055 = vst [vmem:[#allocation2 + $0xb0] sm:$0xff] %v1460_v15 }
 0x2ae   :  { %v1464_v35 = vpop.eup %1463  ;;  %1481 = vrcp.f32 %v962_v32  ;;  %v967_v36 = vadd.f32 1.0, %v1462_v34 }
 0x2af   :  { %v1466_v37 = vpop.eup %1465  ;;  %1053 = vst [vmem:[#allocation2 + $0xa0] sm:$0xff] %v1464_v35 }
 0x2b0   :  { %v1468_v38 = vpop.eup %1467  ;;  %1483 = vrcp.f32 %v967_v36  ;;  %v965_v39 = vadd.f32 1.0, %v1466_v37 }
 0x2b1   :  { %v1470_v40 = vpop.eup %1469  ;;  %1056 = vst [vmem:[#allocation2 + $0xb8] sm:$0xff] %v1468_v38 }
 0x2b2   :  { %v1472_v41 = vpop.eup %1471  ;;  %1485 = vrcp.f32 %v965_v39  ;;  %v968_v43 = vadd.f32 1.0, %v1470_v40 }
 0x2b3   :  { %v1474_v24 = vpop.eup %1473  ;;  %1054 = vst [vmem:[#allocation2 + $0xa8] sm:$0xff] %v1472_v41 }
 0x2b4   :  { %1487 = vrcp.f32 %v968_v43  ;;  %v966_v44 = vadd.f32 1.0, %v1474_v24 }
 0x2b5   :  { %v1476_v33 = vpop.eup %1475 }
 0x2b6   :  { %1059 = vst [vmem:[#allocation2 + $0xd0] sm:$0xff] %v1476_v33  ;;  %1489 = vrcp.f32 %v966_v44 }
 0x2b7   :  { %v1478_v45 = vpop.eup %1477 }
 0x2b8   :  { %1057 = vst [vmem:[#allocation2 + $0xc0] sm:$0xff] %v1478_v45 }
 0x2b9   :  { %v1480_v46 = vpop.eup %1479 }
 0x2ba   :  { %1060 = vst [vmem:[#allocation2 + $0xd8] sm:$0xff] %v1480_v46 }
 0x2bb   :  { %v1482_v47 = vpop.eup %1481 }
 0x2bc   :  { %1058 = vst [vmem:[#allocation2 + $0xc8] sm:$0xff] %v1482_v47 }
 0x2bd   :  { %v1484_v48 = vpop.eup %1483 }
 0x2be   :  { %1063 = vst [vmem:[#allocation2 + $0xf0] sm:$0xff] %v1484_v48 }
 0x2bf   :  { %v1486_v49 = vpop.eup %1485 }
 0x2c0   :  { %1061 = vst [vmem:[#allocation2 + $0xe0] sm:$0xff] %v1486_v49 }
 0x2c1   :  { %v1488_v51 = vpop.eup %1487 }
 0x2c2   :  { %1064 = vst [vmem:[#allocation2 + $0xf8] sm:$0xff] %v1488_v51 }
 0x2c3   :  { %v1490_v52 = vpop.eup %1489 }
 0x2c4   :  { %1062 = vst [vmem:[#allocation2 + $0xe8] sm:$0xff] %v1490_v52 }
 0x2c5   :  { %1502 = shalt.err (!%p1499_p4)
}
 0x2c6   :  { %s1514_s4 = smov 128   ;;  %s1515_s5 = smov 8  }
 0x2c7   :  { %1076 = dma.vmem_to_hbm [thread:$0]  %s1071_s29, 4096, %s1835_s3, [#allocation3], %s1514_s4, %s1514_s4, %s1515_s5  }
 0x2c8   :  { %1511 = dma.done.wait [#allocation3], 4096  }
 0x2c9   :  { %1512 = vsyncadd [#allocation3], 4294963200 }
 0x2ca   :  { %1080 = vsyncpa [#allocation3], 1 }

</bundles_post_ra>
